<compile_context>
chip_gen: v7x
topology: tpu7x:2x2x1
jax: 0.10.0
libtpu: 0.0.40
codegen_flags: <defaults>
</compile_context>

<pallas_src>
import functools

import jax
import jax.numpy as jnp
from jax import lax
from jax.experimental import pallas as pl
from jax.experimental.pallas import tpu as pltpu


def fused_double_q_kernel(
    x_ref,     # (tb, D_pad)  batch on sublanes, features on lanes (HBM-native)
    w1_ref,    # (2H, D_pad)
    b1_ref,    # (2H, 1)
    w2_ref,    # (2H, 2H)  block-diagonal
    b2_ref,    # (2H, 1)
    w3_ref,    # (2H, 1)   per-row output weights (net a rows then net b rows)
    b3_ref,    # (2,)      SMEM scalars: [b3a, b3b]
    out_ref,   # (1, tb)   lane-dense result
    *,
    hidden,    # static: H
):
    x = x_ref[...]

    # Layer 1 of BOTH Q nets: contract on x's feature (last) axis so the result
    # lands batch-on-lanes as (2H, tb).  Relayout of the tiny (tb, D_pad) tile
    # happens in-kernel on the XLU slot -- no wrapper-side HBM transpose.
    h = lax.dot_general(
        w1_ref[...], x,
        dimension_numbers=(((1,), (1,)), ((), ())),
        preferred_element_type=jnp.float32,
    ) + b1_ref[...]
    h = jnp.maximum(h, 0.0)

    # Layer 2 of both nets (block-diagonal W2), still batch-on-lanes.
    h = jnp.dot(w2_ref[...], h, preferred_element_type=jnp.float32) + b2_ref[...]
    h = jnp.maximum(h, 0.0)                       # (2H, tb)

    # Final Linear(H -> 1) per net as VPU multiply + XLU sublane reduction
    # (avoids an N=1 MXU matmul).  Rows [0:H] belong to Q1, [H:2H] to Q2.
    z = h * w3_ref[...]                           # (2H, tb)
    q1 = jnp.sum(z[:hidden, :], axis=0, keepdims=True) + b3_ref[0]   # (1, tb)
    q2 = jnp.sum(z[hidden:, :], axis=0, keepdims=True) + b3_ref[1]   # (1, tb)
    out_ref[...] = jnp.minimum(q1, q2)            # lane-dense, unmasked vst


def fuse_params(p):
    """Precompute fused / transposed / padded weights for the double-Q MLP."""
    D, H = p["w1a"].shape
    # Sublane-aligned padding only (8), NOT 128: the feature axis is never the
    # last dim of a tiled block with a sub-full extent.
    D_pad = 8 * pl.cdiv(D, 8)

    w1f = jnp.zeros((2 * H, D_pad), jnp.float32)
    w1f = w1f.at[:H, :D].set(p["w1a"].T)
    w1f = w1f.at[H:, :D].set(p["w1b"].T)
    b1f = jnp.concatenate([p["b1a"], p["b1b"]], axis=1).T        # (2H, 1)

    w2f = jnp.zeros((2 * H, 2 * H), jnp.float32)
    w2f = w2f.at[:H, :H].set(p["w2a"].T)
    w2f = w2f.at[H:, H:].set(p["w2b"].T)
    b2f = jnp.concatenate([p["b2a"], p["b2b"]], axis=1).T        # (2H, 1)

    w3f = jnp.concatenate([p["w3a"], p["w3b"]], axis=0)          # (2H, 1)
    b3f = jnp.concatenate([p["b3a"][:, 0], p["b3b"][:, 0]])      # (2,)

    return dict(w1=w1f, b1=b1f, w2=w2f, b2=b2f, w3=w3f, b3=b3f,
                hidden=H, d_in=D)


def qgpo_critic_forward(action, state, fused, *, tb=1024, min_pallas_batch=1024):
    """QGPOCritic.forward: min of the two Q-network outputs, shape (B, 1)."""
    x = jnp.concatenate([action, state], axis=-1).astype(jnp.float32)  # (B, D)
    B, D = x.shape
    H = fused["hidden"]
    H2, D_pad = fused["w1"].shape
    assert D == fused["d_in"] and D <= D_pad

    if B < min_pallas_batch:
        # Small-batch fallback: pad/launch overhead dominates; let XLA fuse it.
        xf = jnp.pad(x, ((0, 0), (0, D_pad - D)))
        h = jnp.maximum(xf @ fused["w1"].T + fused["b1"][:, 0], 0.0)
        h = jnp.maximum(h @ fused["w2"].T + fused["b2"][:, 0], 0.0)
        z = h * fused["w3"][:, 0]
        q1 = jnp.sum(z[:, :H], axis=-1, keepdims=True) + fused["b3"][0]
        q2 = jnp.sum(z[:, H:], axis=-1, keepdims=True) + fused["b3"][1]
        return jnp.minimum(q1, q2)

    # Batch tile: multiple of 128, large (512-2048) to amortize the ~0.35us
    # per-grid-step cost, but kept to >= 2 grid steps when the batch allows so
    # v7x's two TensorCores both get work, and never over-padding small B.
    tb = max(128, (min(int(tb), 2048) // 128) * 128)
    b_blocks = pl.cdiv(B, 128)
    if b_blocks >= 2:
        tb = min(tb, 128 * pl.cdiv(b_blocks, 2))
    else:
        tb = 128
    B_pad = tb * pl.cdiv(B, tb)

    # Only zero-pad (batch rows + 1 feature column); NO transpose pass: x stays
    # in (B_pad, D_pad) HBM layout and the kernel contracts on its last axis.
    x_pad = jnp.pad(x, ((0, B_pad - B), (0, D_pad - D)))

    grid = (B_pad // tb,)
    kernel = functools.partial(fused_double_q_kernel, hidden=H)

    flops = 2 * B_pad * H2 * (D_pad + H2) + 6 * B_pad * H2
    bytes_accessed = 4 * (D_pad * B_pad            # streamed x
                          + H2 * D_pad + H2 * H2 + 3 * H2 + 2   # weights
                          + B_pad)                 # (1, B_pad) output

    const = lambda i: (0, 0)  # weights: constant block index -> no re-DMA
    out = pl.pallas_call(
        kernel,
        out_shape=jax.ShapeDtypeStruct((1, B_pad), jnp.float32),
        grid_spec=pltpu.PrefetchScalarGridSpec(
            num_scalar_prefetch=0,
            grid=grid,
            in_specs=[
                pl.BlockSpec((tb, D_pad), lambda i: (i, 0)),   # x (streamed)
                pl.BlockSpec((H2, D_pad), const),              # W1f
                pl.BlockSpec((H2, 1), const),                  # b1f
                pl.BlockSpec((H2, H2), const),                 # W2f
                pl.BlockSpec((H2, 1), const),                  # b2f
                pl.BlockSpec((H2, 1), const),                  # w3f
                pl.BlockSpec(memory_space=pltpu.MemorySpace.SMEM),  # b3f
            ],
            out_specs=pl.BlockSpec((1, tb), lambda i: (0, i)),
        ),
        compiler_params=pltpu.CompilerParams(
            dimension_semantics=("parallel",),   # megacore sharding on v7x
        ),
        cost_estimate=pl.CostEstimate(
            flops=flops, transcendentals=0, bytes_accessed=bytes_accessed),
    )(x_pad, fused["w1"], fused["b1"], fused["w2"], fused["b2"],
      fused["w3"], fused["b3"])

    # Glue: drop padded batch columns, restore (B, 1) torch layout.
    return out[0, :B].reshape(B, 1)


def init_params(key, d_in, hidden):
    """Deterministic synthetic parameters for the two Q MLPs ((in, out) layout)."""
    ks = jax.random.split(key, 12)
    scale = lambda fan_in: 1.0 / jnp.sqrt(jnp.float32(fan_in))

    def linear(kw, kb, fan_in, fan_out):
        w = jax.random.normal(kw, (fan_in, fan_out), jnp.float32) * scale(fan_in)
        b = jax.random.normal(kb, (1, fan_out), jnp.float32) * scale(fan_in)
        return w, b

    w1a, b1a = linear(ks[0], ks[1], d_in, hidden)
    w2a, b2a = linear(ks[2], ks[3], hidden, hidden)
    w3a, b3a = linear(ks[4], ks[5], hidden, 1)
    w1b, b1b = linear(ks[6], ks[7], d_in, hidden)
    w2b, b2b = linear(ks[8], ks[9], hidden, hidden)
    w3b, b3b = linear(ks[10], ks[11], hidden, 1)
    return dict(
        w1a=w1a, b1a=b1a, w2a=w2a, b2a=b2a, w3a=w3a, b3a=b3a,
        w1b=w1b, b1b=b1b, w2b=w2b, b2b=b2b, w3b=w3b, b3b=b3b,
    )


def reference_forward(action, state, p):
    x = jnp.concatenate([action, state], axis=-1)

    def mlp(w1, b1, w2, b2, w3, b3):
        h = jnp.maximum(x @ w1 + b1, 0.0)
        h = jnp.maximum(h @ w2 + b2, 0.0)
        return h @ w3 + b3

    q1 = mlp(p["w1a"], p["b1a"], p["w2a"], p["b2a"], p["w3a"], p["b3a"])
    q2 = mlp(p["w1b"], p["b1b"], p["w2b"], p["b2b"], p["w3b"], p["b3b"])
    return jnp.minimum(q1, q2)


if __name__ == "__main__":
    # Small shapes consistent with a QGPO continuous-control setup.
    A_DIM = 6       # action dim
    S_DIM = 17      # state dim
    HIDDEN = 32     # hidden width of each Q MLP

    key = jax.random.PRNGKey(0)
    k_act, k_state, k_params = jax.random.split(key, 3)
    params = init_params(k_params, A_DIM + S_DIM, HIDDEN)
    fused = fuse_params(params)   # one-time weight fusion (offline in practice)

    # jit the whole wrapper so pad / concat / slice glue fuses with the call.
    pallas_fwd = jax.jit(
        lambda a, s: qgpo_critic_forward(a, s, fused, min_pallas_batch=0))
    xla_fwd = jax.jit(
        lambda a, s: qgpo_critic_forward(a, s, fused))  # small-batch fallback

    ok = True
    # Case 1: tiny batch, force the Pallas path (single grid step).
    B = 16
    action = jax.random.normal(k_act, (B, A_DIM), jnp.float32)
    state = jax.random.normal(k_state, (B, S_DIM), jnp.float32)
    q_min = jax.block_until_ready(pallas_fwd(action, state))
    q_ref = reference_forward(action, state, params)
    ok &= q_min.shape == (B, 1)
    ok &= bool(jnp.allclose(q_min, q_ref, atol=1e-5, rtol=1e-5))
    # Also check the small-batch XLA fallback path.
    q_fb = jax.block_until_ready(xla_fwd(action, state))
    ok &= bool(jnp.allclose(q_fb, q_ref, atol=1e-5, rtol=1e-5))

    # Case 2: batch not a multiple of 128 -> padding + 2-step parallel grid.
    B2 = 300
    k_act2, k_state2 = jax.random.split(jax.random.PRNGKey(1), 2)
    action2 = jax.random.normal(k_act2, (B2, A_DIM), jnp.float32)
    state2 = jax.random.normal(k_state2, (B2, S_DIM), jnp.float32)
    q_min2 = jax.block_until_ready(pallas_fwd(action2, state2))
    q_ref2 = reference_forward(action2, state2, params)
    ok &= q_min2.shape == (B2, 1)
    ok &= bool(jnp.allclose(q_min2, q_ref2, atol=1e-5, rtol=1e-5))

    # TODO(synk): q_target (deepcopy) and q_loss are training-time host logic,
    # not part of forward(); they are intentionally not implemented as kernels.
    assert ok
    print("KERNEL_OK")
</pallas_src>

<mosaic_0001>
module attributes {stable_mosaic.version = 11 : i64} {
  func.func @fused_double_q_kernel(%arg0: i32, %arg1: memref<128x24xf32, #tpu.memory_space<vmem>>, %arg2: memref<64x24xf32, #tpu.memory_space<vmem>>, %arg3: memref<64x1xf32, #tpu.memory_space<vmem>>, %arg4: memref<64x64xf32, #tpu.memory_space<vmem>>, %arg5: memref<64x1xf32, #tpu.memory_space<vmem>>, %arg6: memref<64x1xf32, #tpu.memory_space<vmem>>, %arg7: memref<2xf32, #tpu.memory_space<smem>>, %arg8: memref<1x128xf32, #tpu.memory_space<vmem>>) attributes {dimension_semantics = [#tpu.dimension_semantics<parallel>], iteration_bounds = array<i64: 1>, scalar_prefetch = 0 : i64, scratch_operands = 0 : i64, tpu.core_type = #tpu.core_type<tc>, window_params = [{transform_indices = @transform_0, window_bounds = array<i64: 128, 24>}, {pipeline_mode = #tpu.pipeline_mode<synchronous>, transform_indices = @transform_1, window_bounds = array<i64: 64, 24>}, {pipeline_mode = #tpu.pipeline_mode<synchronous>, transform_indices = @transform_2, window_bounds = array<i64: 64, 1>}, {pipeline_mode = #tpu.pipeline_mode<synchronous>, transform_indices = @transform_3, window_bounds = array<i64: 64, 64>}, {pipeline_mode = #tpu.pipeline_mode<synchronous>, transform_indices = @transform_4, window_bounds = array<i64: 64, 1>}, {pipeline_mode = #tpu.pipeline_mode<synchronous>, transform_indices = @transform_5, window_bounds = array<i64: 64, 1>}, {transform_indices = @transform_6, window_bounds = array<i64: 2>}, {transform_indices = @transform_7, window_bounds = array<i64: 1, 128>}]} {
    %c0 = arith.constant 0 : index
    %c0_0 = arith.constant 0 : index
    %0 = vector.load %arg1[%c0, %c0_0] : memref<128x24xf32, #tpu.memory_space<vmem>>, vector<128x24xf32>
    %c0_1 = arith.constant 0 : index
    %c0_2 = arith.constant 0 : index
    %1 = vector.load %arg2[%c0_1, %c0_2] : memref<64x24xf32, #tpu.memory_space<vmem>>, vector<64x24xf32>
    %cst = arith.constant dense<0.000000e+00> : vector<64x128xf32>
    %2 = tpu.matmul %1, %0, %cst {dimension_numbers = #tpu.dot_dimension_numbers<[1], [1], [0], [0], [0, 0, 1, 0], [], []>} : vector<64x24xf32>, vector<128x24xf32>, vector<64x128xf32> -> vector<64x128xf32>
    %c0_3 = arith.constant 0 : index
    %c0_4 = arith.constant 0 : index
    %3 = vector.load %arg3[%c0_3, %c0_4] : memref<64x1xf32, #tpu.memory_space<vmem>>, vector<64x1xf32>
    %4 = vector.broadcast %3 : vector<64x1xf32> to vector<64x128xf32>
    %5 = arith.addf %2, %4 : vector<64x128xf32>
    %cst_5 = arith.constant 0.000000e+00 : f32
    %6 = vector.broadcast %cst_5 : f32 to vector<64x128xf32>
    %7 = arith.maximumf %5, %6 : vector<64x128xf32>
    %c0_6 = arith.constant 0 : index
    %c0_7 = arith.constant 0 : index
    %8 = vector.load %arg4[%c0_6, %c0_7] : memref<64x64xf32, #tpu.memory_space<vmem>>, vector<64x64xf32>
    %cst_8 = arith.constant dense<0.000000e+00> : vector<64x128xf32>
    %9 = tpu.matmul %8, %7, %cst_8 {dimension_numbers = #tpu.dot_dimension_numbers<[1], [0], [0], [1], [0, 0, 1, 1], [], []>} : vector<64x64xf32>, vector<64x128xf32>, vector<64x128xf32> -> vector<64x128xf32>
    %c0_9 = arith.constant 0 : index
    %c0_10 = arith.constant 0 : index
    %10 = vector.load %arg5[%c0_9, %c0_10] : memref<64x1xf32, #tpu.memory_space<vmem>>, vector<64x1xf32>
    %11 = vector.broadcast %10 : vector<64x1xf32> to vector<64x128xf32>
    %12 = arith.addf %9, %11 : vector<64x128xf32>
    %cst_11 = arith.constant 0.000000e+00 : f32
    %13 = vector.broadcast %cst_11 : f32 to vector<64x128xf32>
    %14 = arith.maximumf %12, %13 : vector<64x128xf32>
    %c0_12 = arith.constant 0 : index
    %c0_13 = arith.constant 0 : index
    %15 = vector.load %arg6[%c0_12, %c0_13] : memref<64x1xf32, #tpu.memory_space<vmem>>, vector<64x1xf32>
    %16 = vector.broadcast %15 : vector<64x1xf32> to vector<64x128xf32>
    %17 = arith.mulf %14, %16 : vector<64x128xf32>
    %18 = vector.extract_strided_slice %17 {offsets = [0, 0], sizes = [32, 128], strides = [1, 1]} : vector<64x128xf32> to vector<32x128xf32>
    %cst_14 = arith.constant dense<0.000000e+00> : vector<128xf32>
    %19 = vector.multi_reduction <add>, %18, %cst_14 [0] : vector<32x128xf32> to vector<128xf32>
    %20 = vector.shape_cast %19 : vector<128xf32> to vector<1x128xf32>
    %c0_15 = arith.constant 0 : index
    %21 = memref.load %arg7[%c0_15] : memref<2xf32, #tpu.memory_space<smem>>
    %22 = vector.broadcast %21 : f32 to vector<1x128xf32>
    %23 = arith.addf %20, %22 : vector<1x128xf32>
    %24 = vector.extract_strided_slice %17 {offsets = [32, 0], sizes = [32, 128], strides = [1, 1]} : vector<64x128xf32> to vector<32x128xf32>
    %cst_16 = arith.constant dense<0.000000e+00> : vector<128xf32>
    %25 = vector.multi_reduction <add>, %24, %cst_16 [0] : vector<32x128xf32> to vector<128xf32>
    %26 = vector.shape_cast %25 : vector<128xf32> to vector<1x128xf32>
    %c1 = arith.constant 1 : index
    %27 = memref.load %arg7[%c1] : memref<2xf32, #tpu.memory_space<smem>>
    %28 = vector.broadcast %27 : f32 to vector<1x128xf32>
    %29 = arith.addf %26, %28 : vector<1x128xf32>
    %30 = arith.minimumf %23, %29 : vector<1x128xf32>
    %c0_17 = arith.constant 0 : index
    %c0_18 = arith.constant 0 : index
    %31 = vector.load %arg8[%c0_17, %c0_18] : memref<1x128xf32, #tpu.memory_space<vmem>>, vector<1x128xf32>
    tpu.vector_store %arg8[%c0_17, %c0_18], %30 {strides = array<i32>} : memref<1x128xf32, #tpu.memory_space<vmem>>, vector<1x128xf32>,
    return
  }
  func.func @transform_0(%arg0: i32) -> (i32, i32) {
    %c0_i32 = arith.constant 0 : i32
    %c0_i32_0 = arith.constant 0 : i32
    return %arg0, %c0_i32 : i32, i32
  }
  func.func @transform_1(%arg0: i32) -> (i32, i32) {
    %c0_i32 = arith.constant 0 : i32
    %c0_i32_0 = arith.constant 0 : i32
    %c0_i32_1 = arith.constant 0 : i32
    return %c0_i32, %c0_i32_0 : i32, i32
  }
  func.func @transform_2(%arg0: i32) -> (i32, i32) {
    %c0_i32 = arith.constant 0 : i32
    %c0_i32_0 = arith.constant 0 : i32
    %c0_i32_1 = arith.constant 0 : i32
    return %c0_i32, %c0_i32_0 : i32, i32
  }
  func.func @transform_3(%arg0: i32) -> (i32, i32) {
    %c0_i32 = arith.constant 0 : i32
    %c0_i32_0 = arith.constant 0 : i32
    %c0_i32_1 = arith.constant 0 : i32
    return %c0_i32, %c0_i32_0 : i32, i32
  }
  func.func @transform_4(%arg0: i32) -> (i32, i32) {
    %c0_i32 = arith.constant 0 : i32
    %c0_i32_0 = arith.constant 0 : i32
    %c0_i32_1 = arith.constant 0 : i32
    return %c0_i32, %c0_i32_0 : i32, i32
  }
  func.func @transform_5(%arg0: i32) -> (i32, i32) {
    %c0_i32 = arith.constant 0 : i32
    %c0_i32_0 = arith.constant 0 : i32
    %c0_i32_1 = arith.constant 0 : i32
    return %c0_i32, %c0_i32_0 : i32, i32
  }
  func.func @transform_6(%arg0: i32) -> i32 {
    %c0_i32 = arith.constant 0 : i32
    %c0_i32_0 = arith.constant 0 : i32
    return %c0_i32 : i32
  }
  func.func @transform_7(%arg0: i32) -> (i32, i32) {
    %c0_i32 = arith.constant 0 : i32
    %c0_i32_0 = arith.constant 0 : i32
    return %c0_i32, %arg0 : i32, i32
  }
}

</mosaic_0001>

<bundles_post_ra>
// kernel: _lambda_.1
= control target key start
LH: loop header
LB: loop body
LE: loop exit
PB: predicated region body
PF: predicated region fallthrough
CT: control target
= control target key end

     0   :  { %12 = vsyncpa [#allocation3], 0  ;;  %s1137_s0 = inlined_call_operand.vmem [shape: f32[128,24], index: 0, kind: input, shape index: {}]   ;;  %s1138_s1 = inlined_call_operand.hbm [shape: f32[64,24], index: 1, kind: input, shape index: {}]   ;;  %s1139_s2 = inlined_call_operand.hbm [shape: f32[64,1], index: 2, kind: input, shape index: {}]   ;;  %s1140_s3 = inlined_call_operand.vmem [shape: f32[64,64], index: 3, kind: input, shape index: {}]   ;;  %s1141_s4 = inlined_call_operand.vmem [shape: f32[64,1], index: 4, kind: input, shape index: {}]   ;;  %s1142_s5 = inlined_call_operand.vmem [shape: f32[64,1], index: 5, kind: input, shape index: {}]   ;;  %s1143_s6 = inlined_call_operand.vmem [shape: f32[2], index: 6, kind: input, shape index: {}]   ;;  %s1144_s7 = inlined_call_operand.vmem [shape: f32[1,128], index: 7, kind: output, shape index: {}]  }
   0x1   :  { %13 = vsyncpa [#allocation6], 0 }
   0x2   :  { %14 = vsyncpa [#allocation4], 0  ;;  %s887_s24 = smov [#allocation2]   ;;  %s825_s28 = scalar_lea.hbm %s1138_s1, 1024 }
   0x3   :  { %s22_s25 = sshll.u32 %s887_s24, 4  ;;  %p826_p0 = scmp.ne.s32.totalorder %s1138_s1, %s825_s28  ;;  %s23_s25 = int_to_ptr.vmem [resolvable:$true] %s22_s25 }
   0x4   :  { %p829_p1 = scmp.lt.u32.totalorder %s825_s28, %s1138_s1 }
   0x6   :  { %p831_p2 = pnand %p829_p1, %p826_p0 }
   0x8   :  { %834 = shalt.err (!%p831_p2)
}
   0x9   :  { %s835_s10 = scalar_lea.vmem %s23_s25, 1024  ;;  %p840_p4 = scmp.lt.s32.totalorder %s23_s25, %s23_s25 }
   0xa   :  { %p836_p3 = scmp.ne.s32.totalorder %s23_s25, %s835_s10  ;;  %p841_p5 = scmp.lt.s32.totalorder %s835_s10, %s835_s10 }
   0xc   :  { %p842_p6 = por %p841_p5, %p840_p4 }
   0xe   :  { %p843_p7 = pnand %p842_p6, %p836_p3 }
  0x10   :  { %846 = shalt.err (!%p843_p7)
}
  0x11   :  { %s888_s11 = smov 128   ;;  %s889_s12 = smov 8  }
  0x12   :  { %28 = dma.hbm_to_vmem [thread:$0]  %s1138_s1, 1024, %s23_s25, [#allocation3], %s888_s11, %s888_s11, %s889_s12  }
  0x13   :  { %s890_s15 = smov [#allocation5]   ;;  %s53_s19 = sshll.u32 %s1143_s6, 4  ;;  %s54_s19 = int_to_ptr.vmem [resolvable:$true] %s53_s19 }
  0x14   :  { %s34_s16 = sshll.u32 %s890_s15, 4  ;;  %s847_s22 = scalar_lea.hbm %s1139_s2, 1024  ;;  %s35_s16 = int_to_ptr.vmem [resolvable:$true] %s34_s16 }
  0x15   :  { %p848_p8 = scmp.ne.s32.totalorder %s1139_s2, %s847_s22  ;;  %p851_p9 = scmp.lt.u32.totalorder %s847_s22, %s1139_s2 }
  0x17   :  { %p853_p10 = pnand %p851_p9, %p848_p8 }
  0x19   :  { %856 = shalt.err (!%p853_p10)
}
  0x1a   :  { %s857_s1 = scalar_lea.vmem %s35_s16, 1024  ;;  %p862_p12 = scmp.lt.s32.totalorder %s35_s16, %s35_s16 }
  0x1b   :  { %p858_p11 = scmp.ne.s32.totalorder %s35_s16, %s857_s1  ;;  %p863_p13 = scmp.lt.s32.totalorder %s857_s1, %s857_s1 }
  0x1d   :  { %p864_p0 = por %p863_p13, %p862_p12 }
  0x1f   :  { %p865_p1 = pnand %p864_p0, %p858_p11 }
  0x21   :  { %868 = shalt.err (!%p865_p1)
}
  0x22   :  { %40 = dma.hbm_to_vmem [thread:$0]  %s1139_s2, 1024, %s35_s16, [#allocation6], %s888_s11, %s888_s11, %s889_s12  }
  0x23   :  { %s869_s28 = scalar_lea.vmem %s54_s19, 16  ;;  %p874_p3 = scmp.lt.s32.totalorder %s54_s19, %s54_s19 }
  0x24   :  { %p870_p2 = scmp.ne.s32.totalorder %s54_s19, %s869_s28  ;;  %p875_p4 = scmp.lt.s32.totalorder %s869_s28, %s869_s28 }
  0x26   :  { %p876_p5 = por %p875_p4, %p874_p3 }
  0x28   :  { %p877_p6 = pnand %p876_p5, %p870_p2 }
  0x2a   :  { %880 = shalt.err (!%p877_p6)
}
  0x2b   :  { %s891_s29 = smov [#allocation7]  }
  0x2c   :  { %56 = dma.vmem_to_smem %s54_s19, 16, %s891_s29, [#allocation4]  }
  0x2d   :  { %881 = dma.done.wait [#allocation3], 1024  }
  0x2e   :  { %882 = vsyncadd [#allocation3], 4294966272 }
  0x2f   :  { %883 = dma.done.wait [#allocation6], 1024  }
  0x30   :  { %884 = vsyncadd [#allocation6], 4294966272 }
  0x31   :  { %885 = dma.done.wait [#allocation4], 16  }
  0x32   :  { %886 = vsyncadd [#allocation4], 4294967280 }
  0x33   :  { %66 = sfence }
  0x34   :  { %v67_v0 = vld [vmem:[%s1137_s0] sm:$0xff]  ;;  %v68_v1 = vld [vmem:[%s1137_s0 + $0x8] sm:$0xff]  ;;  %vm139_vm0 = vcmask 195584   ;;  %v69_v2 = vld [vmem:[%s1137_s0 + $0x10] sm:$0xff]  ;;  %v892_v6 = vmov 0   ;;  %vm381_vm2 = vcmask 523264  }
  0x35   :  { %v753_v3 = vpack.c.bf16 %v68_v1, %v67_v0  ;;  %vm971_vm1 = vmpackc.low %vm139_vm0, %vm139_vm0  ;;  %v70_v5 = vld [vmem:[%s1137_s0 + $0x18] sm:$0xff]  ;;  %823 = vset.pattern.permute.xlu0 %v892_v6  ;;  %824 = vset.pattern.permute.xlu1 %v892_v6  ;;  %v83_v8 = vld [vmem:[#allocation2] sm:$0xff]  ;;  %s640_s28 = sld [smem:[#allocation7 + $0x1]] }
  0x36   :  { %v759_v7 = vpack.c.bf16 %v70_v5, %v69_v2  ;;  %v71_v9 = vld [vmem:[%s1137_s0 + $0x20] sm:$0xff]  ;;  %v72_v10 = vld [vmem:[%s1137_s0 + $0x28] sm:$0xff]  ;;  %713 = vmatprep.mubr.msk.f32.mxu0 %vm139_vm0, %v83_v8  ;;  %v93_v12 = vld [vmem:[#allocation5 + $0x10] sm:$0xff] }
  0x37   :  { %755 = vmatprep.subr.msk.bf16.mxu0 %vm971_vm1, %v753_v3  ;;  %v91_v11 = vld [vmem:[#allocation5] sm:$0xff]  ;;  %v765_v13 = vpack.c.bf16 %v72_v10, %v71_v9  ;;  %111 = vperm.xlu1 %824, %v93_v12   ;;  %v92_v14 = vld [vmem:[#allocation5 + $0x8] sm:$0xff]  ;;  %v94_v15 = vld [vmem:[#allocation5 + $0x18] sm:$0xff] }
  0x38   :  { %758 = vmatpush3.bf16.xpose.msk.msra.mxu0 %vm971_vm1, %v753_v3  ;;  %101 = vperm.xlu0 %823, %v91_v11   ;;  %v73_v16 = vld [vmem:[%s1137_s0 + $0x30] sm:$0xff]  ;;  %v74_v17 = vld [vmem:[%s1137_s0 + $0x38] sm:$0xff]  ;;  %v95_v18 = vld [vmem:[#allocation5 + $0x20] sm:$0xff] }
  0x39   :  { %761 = vmatprep.subr.msk.bf16.mxu0 %vm971_vm1, %v759_v7  ;;  %v96_v19 = vld [vmem:[#allocation5 + $0x28] sm:$0xff]  ;;  %v771_v20 = vpack.c.bf16 %v74_v17, %v73_v16  ;;  %v97_v21 = vld [vmem:[#allocation5 + $0x30] sm:$0xff]  ;;  %v98_v22 = vld [vmem:[#allocation5 + $0x38] sm:$0xff] }
  0x3a   :  { %v75_v23 = vld [vmem:[%s1137_s0 + $0x40] sm:$0xff]  ;;  %v76_v24 = vld [vmem:[%s1137_s0 + $0x48] sm:$0xff]  ;;  %v77_v30 = vld [vmem:[%s1137_s0 + $0x50] sm:$0xff] }
  0x3b   :  { %116 = vperm.xlu1 %824, %v94_v15   ;;  %v333_v25 = vld [vmem:[%s1141_s4] sm:$0xff]  ;;  %v334_v26 = vld [vmem:[%s1141_s4 + $0x8] sm:$0xff]  ;;  %v777_v27 = vpack.c.bf16 %v76_v24, %v75_v23  ;;  %v78_v31 = vld [vmem:[%s1137_s0 + $0x58] sm:$0xff] }
  0x3c   :  { %106 = vperm.xlu0 %823, %v92_v14   ;;  %v337_v28 = vld [vmem:[%s1141_s4 + $0x20] sm:$0xff]  ;;  %v338_v29 = vld [vmem:[%s1141_s4 + $0x28] sm:$0xff]  ;;  %v335_v32 = vld [vmem:[%s1141_s4 + $0x10] sm:$0xff]  ;;  %v783_v34 = vpack.c.bf16 %v78_v31, %v77_v30 }
  0x3d   :  { %v339_v33 = vld [vmem:[%s1141_s4 + $0x30] sm:$0xff]  ;;  %v336_v35 = vld [vmem:[%s1141_s4 + $0x18] sm:$0xff]  ;;  %v79_v37 = vld [vmem:[%s1137_s0 + $0x60] sm:$0xff] }
  0x3e   :  { %v340_v36 = vld [vmem:[%s1141_s4 + $0x38] sm:$0xff]  ;;  %v80_v38 = vld [vmem:[%s1137_s0 + $0x68] sm:$0xff]  ;;  %v519_v39 = vld [vmem:[%s1142_s5] sm:$0xff] }
  0x3f   :  { %126 = vperm.xlu1 %824, %v96_v19   ;;  %v520_v40 = vld [vmem:[%s1142_s5 + $0x8] sm:$0xff]  ;;  %v789_v41 = vpack.c.bf16 %v80_v38, %v79_v37  ;;  %v523_v42 = vld [vmem:[%s1142_s5 + $0x20] sm:$0xff]  ;;  %v81_v44 = vld [vmem:[%s1137_s0 + $0x70] sm:$0xff] }
  0x40   :  { %764 = vmatpush3.bf16.xpose.msk.msra.mxu0 %vm971_vm1, %v759_v7  ;;  %121 = vperm.xlu0 %823, %v95_v18   ;;  %v524_v43 = vld [vmem:[%s1142_s5 + $0x28] sm:$0xff]  ;;  %v82_v45 = vld [vmem:[%s1137_s0 + $0x78] sm:$0xff]  ;;  %v521_v46 = vld [vmem:[%s1142_s5 + $0x10] sm:$0xff] }
  0x41   :  { %767 = vmatprep.subr.msk.bf16.mxu0 %vm971_vm1, %v765_v13  ;;  %v525_v47 = vld [vmem:[%s1142_s5 + $0x30] sm:$0xff]  ;;  %v795_v48 = vpack.c.bf16 %v82_v45, %v81_v44  ;;  %v522_v49 = vld [vmem:[%s1142_s5 + $0x18] sm:$0xff]  ;;  %v84_v51 = vld [vmem:[#allocation2 + $0x8] sm:$0xff] }
  0x42   :  { %v526_v50 = vld [vmem:[%s1142_s5 + $0x38] sm:$0xff]  ;;  %v85_v52 = vld [vmem:[#allocation2 + $0x10] sm:$0xff]  ;;  %v87_v54 = vld [vmem:[#allocation2 + $0x20] sm:$0xff] }
  0x43   :  { %136 = vperm.xlu1 %824, %v98_v22   ;;  %v86_v53 = vld [vmem:[#allocation2 + $0x18] sm:$0xff]  ;;  %v88_v55 = vld [vmem:[#allocation2 + $0x28] sm:$0xff]  ;;  %v89_v56 = vld [vmem:[#allocation2 + $0x30] sm:$0xff] }
  0x44   :  { %131 = vperm.xlu0 %823, %v97_v21   ;;  %v90_v57 = vld [vmem:[#allocation2 + $0x38] sm:$0xff]  ;;  %v325_v58 = vld [vmem:[%s1140_s3] sm:$0xff]  ;;  %v326_v31 = vld [vmem:[%s1140_s3 + $0x8] sm:$0xff] }
  0x45   :  { %741 = vmatprep.mubr.msk.f32.mxu1 %vm381_vm2, %v325_v58  ;;  %v332_v37 = vld [vmem:[%s1140_s3 + $0x38] sm:$0xff] }
  0x47   :  { %348 = vperm.xlu1 %824, %v334_v26  }
  0x48   :  { %770 = vmatpush3.bf16.xpose.msk.msra.mxu0 %vm971_vm1, %v765_v13  ;;  %343 = vperm.xlu0 %823, %v333_v25  }
  0x49   :  { %773 = vmatprep.subr.msk.bf16.mxu0 %vm971_vm1, %v771_v20 }
  0x4b   :  { %368 = vperm.xlu1 %824, %v338_v29  }
  0x4c   :  { %363 = vperm.xlu0 %823, %v337_v28  }
  0x4f   :  { %373 = vperm.xlu1 %824, %v339_v33   ;;  %v328_v33 = vld [vmem:[%s1140_s3 + $0x18] sm:$0xff] }
  0x50   :  { %776 = vmatpush3.bf16.xpose.msk.msra.mxu0 %vm971_vm1, %v771_v20  ;;  %353 = vperm.xlu0 %823, %v335_v32   ;;  %v327_v32 = vld [vmem:[%s1140_s3 + $0x10] sm:$0xff] }
  0x51   :  { %779 = vmatprep.subr.msk.bf16.mxu0 %vm971_vm1, %v777_v27 }
  0x53   :  { %378 = vperm.xlu1 %824, %v340_v36   ;;  %v331_v36 = vld [vmem:[%s1140_s3 + $0x30] sm:$0xff] }
  0x54   :  { %358 = vperm.xlu0 %823, %v336_v35   ;;  %v330_v35 = vld [vmem:[%s1140_s3 + $0x28] sm:$0xff] }
  0x57   :  { %534 = vperm.xlu1 %824, %v520_v40  }
  0x58   :  { %782 = vmatpush3.bf16.xpose.msk.msra.mxu0 %vm971_vm1, %v777_v27  ;;  %529 = vperm.xlu0 %823, %v519_v39  }
  0x59   :  { %785 = vmatprep.subr.msk.bf16.mxu0 %vm971_vm1, %v783_v34 }
  0x5b   :  { %554 = vperm.xlu1 %824, %v524_v43  }
  0x5c   :  { %549 = vperm.xlu0 %823, %v523_v42  }
  0x5f   :  { %559 = vperm.xlu1 %824, %v525_v47  }
  0x60   :  { %788 = vmatpush3.bf16.xpose.msk.msra.mxu0 %vm971_vm1, %v783_v34  ;;  %539 = vperm.xlu0 %823, %v521_v46   ;;  %v329_v34 = vld [vmem:[%s1140_s3 + $0x20] sm:$0xff]  ;;  %s584_s3 = sld [smem:[#allocation7]] }
  0x61   :  { %791 = vmatprep.subr.msk.bf16.mxu0 %vm971_vm1, %v789_v41 }
  0x63   :  { %564 = vperm.xlu1 %824, %v526_v50  }
  0x64   :  { %544 = vperm.xlu0 %823, %v522_v49  }
  0x68   :  { %794 = vmatpush3.bf16.xpose.msk.msra.mxu0 %vm971_vm1, %v789_v41 }
  0x69   :  { %797 = vmatprep.subr.msk.bf16.mxu0 %vm971_vm1, %v795_v48 }
  0x70   :  { %800 = vmatpush3.bf16.xpose.msk.msra.mxu0 %vm971_vm1, %v795_v48 }
  0x77   :  { %714 = vmatmul.mubr.msk.f32.vlgmr.msra.gmra.mrb[0].mxu0 %vm139_vm0, %v84_v51 }
  0x78   :  { %716 = vmatprep.mubr.msk.f32.mxu0 %vm139_vm0, %v85_v52 }
  0x7b   :  { %717 = vmatmul.mubr.msk.f32.gmra.mrb[2].mxu0 %vm139_vm0, %v86_v53 }
  0x7c   :  { %719 = vmatprep.mubr.msk.f32.mxu0 %vm139_vm0, %v87_v54 }
  0x7f   :  { %720 = vmatmul.mubr.msk.f32.gmra.mrb[4].mxu0 %vm139_vm0, %v88_v55 }
  0x80   :  { %722 = vmatprep.mubr.msk.f32.mxu0 %vm139_vm0, %v89_v56 }
  0x83   :  { %723 = vmatmul.mubr.msk.f32.gmra.mrb[6].mxu0 %vm139_vm0, %v90_v57 }
  0xb6   :  { %v112_v60 = vpop.permute.xlu1 %111 }
  0xb7   :  { %v102_v59 = vpop.permute.xlu0 %101 }
  0xba   :  { %v117_v62 = vpop.permute.xlu1 %116 }
  0xbb   :  { %v107_v61 = vpop.permute.xlu0 %106 }
  0xbe   :  { %v127_v8 = vpop.permute.xlu1 %126 }
  0xbf   :  { %v122_v11 = vpop.permute.xlu0 %121 }
  0xc2   :  { %v137_v20 = vpop.permute.xlu1 %136 }
  0xc3   :  { %v132_v23 = vpop.permute.xlu0 %131 }
  0xc6   :  { %v349_v40 = vpop.permute.xlu1 %348 }
  0xc7   :  { %v344_v38 = vpop.permute.xlu0 %343 }
  0xca   :  { %v369_v42 = vpop.permute.xlu1 %368 }
  0xcb   :  { %v364_v39 = vpop.permute.xlu0 %363 }
  0xce   :  { %v374_v44 = vpop.permute.xlu1 %373 }
  0xcf   :  { %v354_v41 = vpop.permute.xlu0 %353 }
  0xd2   :  { %v379_v46 = vpop.permute.xlu1 %378 }
  0xd3   :  { %v359_v43 = vpop.permute.xlu0 %358 }
  0xd6   :  { %v535_v49 = vpop.permute.xlu1 %534 }
  0xd7   :  { %v530_v45 = vpop.permute.xlu0 %529 }
  0xdb   :  { %v550_v47 = vpop.permute.xlu0 %549 }
  0xdf   :  { %v540_v56 = vpop.permute.xlu0 %539 }
 0x14a   :  { %v715_v63 = vpop.f32.mrb[0].mxu0 }
 0x14b   :  { %v284_v0 = vadd.f32 %v715_v63, %v107_v61  ;;  %v278_v1 = vpop.f32.mrb[1].mxu0 }
 0x14c   :  { %v279_v2 = vadd.f32 %v278_v1, %v102_v59 }
 0x14d   :  { %v318_v3 = vmax.f32 %v284_v0, 0.0 }
 0x14e   :  { %v317_v4 = vmax.f32 %v279_v2, 0.0  ;;  %v718_v5 = vpop.f32.mrb[2].mxu0 }
 0x14f   :  { %v294_v6 = vadd.f32 %v718_v5, %v117_v62  ;;  %v288_v7 = vpop.f32.mrb[3].mxu0  ;;  %v555_v62 = vpop.permute.xlu1 %554 }
 0x150   :  { %v289_v9 = vadd.f32 %v288_v7, %v112_v60  ;;  %v801_v10 = vpack.c.bf16 %v318_v3, %v317_v4  ;;  %v545_v7 = vpop.permute.xlu0 %544 }
 0x151   :  { %v320_v12 = vmax.f32 %v294_v6, 0.0 }
 0x152   :  { %v319_v13 = vmax.f32 %v289_v9, 0.0  ;;  %v721_v14 = vpop.f32.mrb[4].mxu0  ;;  %802 = vmatprep.subr.bf16.mxu1 %v801_v10 }
 0x153   :  { %v304_v15 = vadd.f32 %v721_v14, %v127_v8  ;;  %v298_v16 = vpop.f32.mrb[5].mxu0  ;;  %804 = vmatpush3.bf16.msra.mxu1 %v801_v10 }
 0x154   :  { %v805_v17 = vpack.c.bf16 %v320_v12, %v319_v13  ;;  %v299_v18 = vadd.f32 %v298_v16, %v122_v11  ;;  %v560_v13 = vpop.permute.xlu1 %559 }
 0x155   :  { %v322_v19 = vmax.f32 %v304_v15, 0.0 }
 0x156   :  { %v321_v21 = vmax.f32 %v299_v18, 0.0  ;;  %v724_v22 = vpop.f32.mrb[6].mxu0  ;;  %806 = vmatprep.subr.bf16.mxu1 %v805_v17 }
 0x157   :  { %v314_v24 = vadd.f32 %v724_v22, %v137_v20  ;;  %v308_v25 = vpop.f32.mrb[7].mxu0  ;;  %808 = vmatpush3.bf16.msra.mxu1 %v805_v17 }
 0x158   :  { %v809_v26 = vpack.c.bf16 %v322_v19, %v321_v21  ;;  %v309_v27 = vadd.f32 %v308_v25, %v132_v23 }
 0x159   :  { %v324_v28 = vmax.f32 %v314_v24, 0.0 }
 0x15a   :  { %v323_v29 = vmax.f32 %v309_v27, 0.0  ;;  %810 = vmatprep.subr.bf16.mxu1 %v809_v26 }
 0x15b   :  { %812 = vmatpush3.bf16.msra.mxu1 %v809_v26  ;;  %v565_v26 = vpop.permute.xlu1 %564 }
 0x15c   :  { %v813_v30 = vpack.c.bf16 %v324_v28, %v323_v29 }
 0x15e   :  { %814 = vmatprep.subr.bf16.mxu1 %v813_v30 }
 0x15f   :  { %816 = vmatpush3.bf16.msra.mxu1 %v813_v30 }
 0x162   :  { %742 = vmatmul.mubr.msk.f32.vlgmr.msra.gmra.mrb[0].mxu1 %vm381_vm2, %v326_v31 }
 0x163   :  { %744 = vmatprep.mubr.msk.f32.mxu1 %vm381_vm2, %v327_v32 }
 0x166   :  { %745 = vmatmul.mubr.msk.f32.gmra.mrb[2].mxu1 %vm381_vm2, %v328_v33 }
 0x167   :  { %747 = vmatprep.mubr.msk.f32.mxu1 %vm381_vm2, %v329_v34 }
 0x16a   :  { %748 = vmatmul.mubr.msk.f32.gmra.mrb[4].mxu1 %vm381_vm2, %v330_v35 }
 0x16b   :  { %750 = vmatprep.mubr.msk.f32.mxu1 %vm381_vm2, %v331_v36 }
 0x16e   :  { %751 = vmatmul.mubr.msk.f32.gmra.mrb[6].mxu1 %vm381_vm2, %v332_v37 }
 0x235   :  { %v743_v48 = vpop.f32.mrb[0].mxu1 }
 0x236   :  { %v478_v50 = vadd.f32 %v743_v48, %v349_v40  ;;  %v472_v51 = vpop.f32.mrb[1].mxu1  ;;  %v597_v40 = vstv %s640_s28 }
 0x237   :  { %v473_v52 = vadd.f32 %v472_v51, %v344_v38 }
 0x238   :  { %v512_v53 = vmax.f32 %v478_v50, 0.0 }
 0x239   :  { %v511_v54 = vmax.f32 %v473_v52, 0.0  ;;  %v746_v55 = vpop.f32.mrb[2].mxu1 }
 0x23a   :  { %v568_v57 = vmul.f32 %v535_v49, %v512_v53  ;;  %v488_v58 = vadd.f32 %v746_v55, %v359_v43  ;;  %v482_v59 = vpop.f32.mrb[3].mxu1 }
 0x23b   :  { %v567_v60 = vmul.f32 %v530_v45, %v511_v54  ;;  %v483_v61 = vadd.f32 %v482_v59, %v354_v41 }
 0x23c   :  { %v514_v0 = vmax.f32 %v488_v58, 0.0 }
 0x23d   :  { %v575_v63 = vadd.f32 %v568_v57, %v567_v60  ;;  %v513_v1 = vmax.f32 %v483_v61, 0.0  ;;  %v749_v2 = vpop.f32.mrb[4].mxu1 }
 0x23e   :  { %v498_v3 = vadd.f32 %v749_v2, %v369_v42  ;;  %v492_v4 = vpop.f32.mrb[5].mxu1  ;;  %v570_v9 = vmul.f32 %v545_v7, %v514_v0 }
 0x23f   :  { %v569_v5 = vmul.f32 %v540_v56, %v513_v1  ;;  %v493_v6 = vadd.f32 %v492_v4, %v364_v39  ;;  %v585_v39 = vstv %s584_s3 }
 0x240   :  { %v516_v8 = vmax.f32 %v498_v3, 0.0 }
 0x241   :  { %v576_v10 = vadd.f32 %v575_v63, %v569_v5  ;;  %v515_v11 = vmax.f32 %v493_v6, 0.0  ;;  %v752_v12 = vpop.f32.mrb[6].mxu1 }
 0x242   :  { %v572_v14 = vmul.f32 %v555_v62, %v516_v8  ;;  %v508_v15 = vadd.f32 %v752_v12, %v379_v46  ;;  %v502_v16 = vpop.f32.mrb[7].mxu1 }
 0x243   :  { %v577_v17 = vadd.f32 %v576_v10, %v570_v9  ;;  %v571_v18 = vmul.f32 %v550_v47, %v515_v11  ;;  %v503_v19 = vadd.f32 %v502_v16, %v374_v44 }
 0x244   :  { %v518_v22 = vmax.f32 %v508_v15, 0.0 }
 0x245   :  { %v578_v20 = vrot.slane %v577_v17, 4  ;;  %v587_v21 = vadd.f32 %v572_v14, %v571_v18  ;;  %v517_v23 = vmax.f32 %v503_v19, 0.0 }
 0x246   :  { %v574_v28 = vmul.f32 %v565_v26, %v518_v22 }
 0x247   :  { %v579_v24 = vadd.f32 %v578_v20, %v577_v17  ;;  %v573_v25 = vmul.f32 %v560_v13, %v517_v23 }
 0x249   :  { %v580_v27 = vrot.slane %v579_v24, 2  ;;  %v588_v29 = vadd.f32 %v587_v21, %v573_v25 }
 0x24b   :  { %v589_v30 = vadd.f32 %v588_v29, %v574_v28  ;;  %v581_v31 = vadd.f32 %v580_v27, %v579_v24 }
 0x24d   :  { %v590_v32 = vrot.slane %v589_v30, 4  ;;  %v582_v34 = vrot.slane %v581_v31, 1 }
 0x24f   :  { %v591_v33 = vadd.f32 %v590_v32, %v589_v30  ;;  %v583_v37 = vadd.f32 %v582_v34, %v581_v31 }
 0x251   :  { %v592_v35 = vrot.slane %v591_v33, 2  ;;  %v586_v42 = vadd.f32 %v585_v39, %v583_v37 }
 0x253   :  { %v593_v36 = vadd.f32 %v592_v35, %v591_v33 }
 0x255   :  { %v594_v38 = vrot.slane %v593_v36, 1 }
 0x257   :  { %v595_v41 = vadd.f32 %v594_v38, %v593_v36 }
 0x259   :  { %v598_v43 = vadd.f32 %v597_v40, %v595_v41 }
 0x25b   :  { %v599_v44 = vmin.f32 %v586_v42, %v598_v43 }
 0x25d   :  { %600 = vst [vmem:[%s1144_s7] sm:$0x1] %v599_v44 }
 0x25e   :  { %605 = vsyncpa [#allocation3], 1 }
 0x25f   :  { %606 = vsyncpa [#allocation6], 1 }
 0x260   :  { %607 = vsyncpa [#allocation4], 1 }

</bundles_post_ra>
